<compile_context>
chip_gen: v6e
topology: v6e:2x2x1
jax: 0.10.0
libtpu: 0.0.40
codegen_flags: <defaults>
</compile_context>

<pallas_src>
import jax
import jax.numpy as jnp
from jax.experimental import pallas as pl
from jax.experimental.pallas import tpu as pltpu


def _round_up(v, m):
    return (v + m - 1) // m * m


# -----------------------------------------------------------------------------
# Fused MLP kernel: one grid step = one (C, t_hw) slab of one image.
#   o = W2 @ relu6(W1 @ x + b1) + b2        (all in VMEM, f32 accumulation)
# -----------------------------------------------------------------------------
def _mlp_kernel(x_ref, w1_ref, b1_ref, w2_ref, b2_ref, o_ref):
    # x_ref:  (C, Thw)   bf16      w1_ref: (Hd, C)    bf16   b1_ref: (Hd, 1)  f32
    # w2_ref: (Cout, Hd) bf16      b2_ref: (Cout, 1)  f32    o_ref: (Cout, Thw)
    h = jnp.dot(w1_ref[...], x_ref[...], preferred_element_type=jnp.float32)
    h = jnp.clip(h + b1_ref[...], 0.0, 6.0)                       # bias + ReLU6
    y = jnp.dot(w2_ref[...], h.astype(w2_ref.dtype),
                preferred_element_type=jnp.float32)
    o_ref[...] = (y + b2_ref[...]).astype(o_ref.dtype)


def prepare_mlp_params(w1, b1, w2, b2, *, compute_dtype=jnp.bfloat16):
    """One-time weight prep (hoisted out of the per-call path).
    w1: (Hd, Cin, 1, 1); b1: (Hd,); w2: (Cout, Hd, 1, 1); b2: (Cout,)."""
    hidden, cin = w1.shape[0], w1.shape[1]
    cout = w2.shape[0]
    w1m = w1.reshape(hidden, cin).astype(compute_dtype)        # (Hd, Cin)
    w2m = w2.reshape(cout, hidden).astype(compute_dtype)       # (Cout, Hd)
    b1r = b1.reshape(hidden, 1).astype(jnp.float32)
    b2r = b2.reshape(cout, 1).astype(jnp.float32)
    return w1m, b1r, w2m, b2r


def mlp_forward(x, w1m, b1r, w2m, b2r, *, block_hw=1024,
                out_dtype=jnp.bfloat16):
    """PyTorch Mlp forward on NCHW input x: (N, C, H, W).
    Weights must be pre-prepped with prepare_mlp_params().
    Returns (N, Cout, H, W) in `out_dtype` (bf16 by default; pass
    out_dtype=jnp.float32 for an f32 result straight from the kernel)."""
    N, C, H, W = x.shape
    hidden = w1m.shape[0]
    cout = w2m.shape[0]
    HW = H * W

    # NCHW -> (N, C, HW): a contiguous reshape, no transpose / HBM traffic.
    xs = x.reshape(N, C, HW).astype(w1m.dtype)

    if HW <= block_hw:
        t_hw, HWp = HW, HW                         # one lane-dense slab / image
    else:
        t_hw = max(128, (block_hw // 128) * 128)   # keep tiles lane-aligned
        HWp = _round_up(HW, t_hw)
        if HWp != HW:
            xs = jnp.pad(xs, ((0, 0), (0, 0), (0, HWp - HW)))

    grid = (N, HWp // t_hw)

    out = pl.pallas_call(
        _mlp_kernel,
        out_shape=jax.ShapeDtypeStruct((N, cout, HWp), out_dtype),
        grid_spec=pltpu.PrefetchScalarGridSpec(
            num_scalar_prefetch=0,
            grid=grid,
            in_specs=[
                pl.BlockSpec((None, C, t_hw), lambda n, j: (n, 0, j)),  # x slab
                pl.BlockSpec((hidden, C), lambda n, j: (0, 0)),         # W1 (resident)
                pl.BlockSpec((hidden, 1), lambda n, j: (0, 0)),         # b1
                pl.BlockSpec((cout, hidden), lambda n, j: (0, 0)),      # W2 (resident)
                pl.BlockSpec((cout, 1), lambda n, j: (0, 0)),           # b2
            ],
            out_specs=pl.BlockSpec((None, cout, t_hw), lambda n, j: (n, 0, j)),
        ),
        compiler_params=pltpu.CompilerParams(
            dimension_semantics=("parallel", "parallel")),
    )(xs, w1m, b1r, w2m, b2r)

    if HWp != HW:
        out = out[:, :, :HW]
    return out.reshape(N, cout, H, W)


# -----------------------------------------------------------------------------
# Pure-JAX f32 reference (for correctness check)
# -----------------------------------------------------------------------------
def mlp_reference(x, w1, b1, w2, b2):
    h = jnp.einsum("nchw,oc->nohw", x, w1.reshape(w1.shape[0], -1))
    h = jnp.clip(h + b1[None, :, None, None], 0.0, 6.0)
    y = jnp.einsum("nchw,oc->nohw", h, w2.reshape(w2.shape[0], -1))
    return y + b2[None, :, None, None]


# -----------------------------------------------------------------------------
if __name__ == "__main__":
    key = jax.random.PRNGKey(0)
    kx, k1, kb1, k2, kb2 = jax.random.split(key, 5)

    # Small shapes consistent with how Mlp is used in UNetFormer's Block:
    # dim=64, mlp_ratio=4 -> hidden=256, out=64; batch=2, 16x16 spatial.
    N, Cin, H, W = 2, 64, 16, 16
    hidden, Cout = 4 * Cin, Cin

    x = jax.random.normal(kx, (N, Cin, H, W), jnp.float32)
    w1 = jax.random.normal(k1, (hidden, Cin, 1, 1), jnp.float32) / (Cin ** 0.5)
    b1 = 0.1 * jax.random.normal(kb1, (hidden,), jnp.float32)
    w2 = jax.random.normal(k2, (Cout, hidden, 1, 1), jnp.float32) / (hidden ** 0.5)
    b2 = 0.1 * jax.random.normal(kb2, (Cout,), jnp.float32)

    # Weight prep happens once, outside the per-call path.
    params = prepare_mlp_params(w1, b1, w2, b2)

    fwd = jax.jit(mlp_forward)
    out = fwd(x, *params)
    jax.block_until_ready(out)

    assert out.shape == (N, Cout, H, W), out.shape
    out_f32 = out.astype(jnp.float32)
    assert bool(jnp.all(jnp.isfinite(out_f32)))

    ref = mlp_reference(x, w1, b1, w2, b2)
    err = float(jnp.max(jnp.abs(out_f32 - ref)))
    scale = float(jnp.max(jnp.abs(ref))) + 1e-6
    # bf16 MXU operands + bf16 output with f32 accumulation: ~1e-2 relative.
    assert err / scale < 5e-2, (err, scale)

    print("KERNEL_OK")
</pallas_src>

<mosaic_0001>
module attributes {stable_mosaic.version = 11 : i64} {
  func.func @_mlp_kernel(%arg0: i32, %arg1: i32, %arg2: memref<1x64x256xbf16, #tpu.memory_space<vmem>>, %arg3: memref<256x64xbf16, #tpu.memory_space<vmem>>, %arg4: memref<256x1xf32, #tpu.memory_space<vmem>>, %arg5: memref<64x256xbf16, #tpu.memory_space<vmem>>, %arg6: memref<64x1xf32, #tpu.memory_space<vmem>>, %arg7: memref<1x64x256xbf16, #tpu.memory_space<vmem>>) attributes {dimension_semantics = [#tpu.dimension_semantics<parallel>, #tpu.dimension_semantics<parallel>], iteration_bounds = array<i64: 2, 1>, scalar_prefetch = 0 : i64, scratch_operands = 0 : i64, tpu.core_type = #tpu.core_type<tc>, window_params = [{transform_indices = @transform_0, window_bounds = array<i64: 1, 64, 256>}, {pipeline_mode = #tpu.pipeline_mode<synchronous>, transform_indices = @transform_1, window_bounds = array<i64: 256, 64>}, {pipeline_mode = #tpu.pipeline_mode<synchronous>, transform_indices = @transform_2, window_bounds = array<i64: 256, 1>}, {pipeline_mode = #tpu.pipeline_mode<synchronous>, transform_indices = @transform_3, window_bounds = array<i64: 64, 256>}, {pipeline_mode = #tpu.pipeline_mode<synchronous>, transform_indices = @transform_4, window_bounds = array<i64: 64, 1>}, {transform_indices = @transform_5, window_bounds = array<i64: 1, 64, 256>}]} {
    %c0 = arith.constant 0 : index
    %c0_0 = arith.constant 0 : index
    %0 = vector.load %arg3[%c0, %c0_0] : memref<256x64xbf16, #tpu.memory_space<vmem>>, vector<256x64xbf16>
    %c0_1 = arith.constant 0 : index
    %c0_2 = arith.constant 0 : index
    %c0_3 = arith.constant 0 : index
    %1 = vector.load %arg2[%c0_1, %c0_2, %c0_3] : memref<1x64x256xbf16, #tpu.memory_space<vmem>>, vector<1x64x256xbf16>
    %2 = vector.shape_cast %1 : vector<1x64x256xbf16> to vector<64x256xbf16>
    %cst = arith.constant dense<0.000000e+00> : vector<256x256xf32>
    %3 = tpu.matmul %0, %2, %cst {dimension_numbers = #tpu.dot_dimension_numbers<[1], [0], [0], [1], [0, 0, 1, 1], [], []>} : vector<256x64xbf16>, vector<64x256xbf16>, vector<256x256xf32> -> vector<256x256xf32>
    %c0_4 = arith.constant 0 : index
    %c0_5 = arith.constant 0 : index
    %4 = vector.load %arg4[%c0_4, %c0_5] : memref<256x1xf32, #tpu.memory_space<vmem>>, vector<256x1xf32>
    %5 = vector.broadcast %4 : vector<256x1xf32> to vector<256x256xf32>
    %6 = arith.addf %3, %5 : vector<256x256xf32>
    %cst_6 = arith.constant 0.000000e+00 : f32
    %cst_7 = arith.constant 6.000000e+00 : f32
    %7 = vector.broadcast %cst_6 : f32 to vector<256x256xf32>
    %8 = arith.maximumf %7, %6 : vector<256x256xf32>
    %9 = vector.broadcast %cst_7 : f32 to vector<256x256xf32>
    %10 = arith.minimumf %9, %8 : vector<256x256xf32>
    %c0_8 = arith.constant 0 : index
    %c0_9 = arith.constant 0 : index
    %11 = vector.load %arg5[%c0_8, %c0_9] : memref<64x256xbf16, #tpu.memory_space<vmem>>, vector<64x256xbf16>
    %12 = arith.truncf %10 : vector<256x256xf32> to vector<256x256xbf16>
    %cst_10 = arith.constant dense<0.000000e+00> : vector<64x256xf32>
    %13 = tpu.matmul %11, %12, %cst_10 {dimension_numbers = #tpu.dot_dimension_numbers<[1], [0], [0], [1], [0, 0, 1, 1], [], []>} : vector<64x256xbf16>, vector<256x256xbf16>, vector<64x256xf32> -> vector<64x256xf32>
    %c0_11 = arith.constant 0 : index
    %c0_12 = arith.constant 0 : index
    %14 = vector.load %arg6[%c0_11, %c0_12] : memref<64x1xf32, #tpu.memory_space<vmem>>, vector<64x1xf32>
    %15 = vector.broadcast %14 : vector<64x1xf32> to vector<64x256xf32>
    %16 = arith.addf %13, %15 : vector<64x256xf32>
    %17 = arith.truncf %16 : vector<64x256xf32> to vector<64x256xbf16>
    %c0_13 = arith.constant 0 : index
    %c0_14 = arith.constant 0 : index
    %c0_15 = arith.constant 0 : index
    %18 = vector.load %arg7[%c0_13, %c0_14, %c0_15] : memref<1x64x256xbf16, #tpu.memory_space<vmem>>, vector<1x64x256xbf16>
    %19 = vector.shape_cast %18 : vector<1x64x256xbf16> to vector<64x256xbf16>
    %20 = vector.shape_cast %17 : vector<64x256xbf16> to vector<1x64x256xbf16>
    tpu.vector_store %arg7[%c0_13, %c0_14, %c0_15], %20 {strides = array<i32>} : memref<1x64x256xbf16, #tpu.memory_space<vmem>>, vector<1x64x256xbf16>,
    return
  }
  func.func @transform_0(%arg0: i32, %arg1: i32) -> (i32, i32, i32) {
    %c0_i32 = arith.constant 0 : i32
    %c0_i32_0 = arith.constant 0 : i32
    return %arg0, %c0_i32, %arg1 : i32, i32, i32
  }
  func.func @transform_1(%arg0: i32, %arg1: i32) -> (i32, i32) {
    %c0_i32 = arith.constant 0 : i32
    %c0_i32_0 = arith.constant 0 : i32
    %c0_i32_1 = arith.constant 0 : i32
    return %c0_i32, %c0_i32_0 : i32, i32
  }
  func.func @transform_2(%arg0: i32, %arg1: i32) -> (i32, i32) {
    %c0_i32 = arith.constant 0 : i32
    %c0_i32_0 = arith.constant 0 : i32
    %c0_i32_1 = arith.constant 0 : i32
    return %c0_i32, %c0_i32_0 : i32, i32
  }
  func.func @transform_3(%arg0: i32, %arg1: i32) -> (i32, i32) {
    %c0_i32 = arith.constant 0 : i32
    %c0_i32_0 = arith.constant 0 : i32
    %c0_i32_1 = arith.constant 0 : i32
    return %c0_i32, %c0_i32_0 : i32, i32
  }
  func.func @transform_4(%arg0: i32, %arg1: i32) -> (i32, i32) {
    %c0_i32 = arith.constant 0 : i32
    %c0_i32_0 = arith.constant 0 : i32
    %c0_i32_1 = arith.constant 0 : i32
    return %c0_i32, %c0_i32_0 : i32, i32
  }
  func.func @transform_5(%arg0: i32, %arg1: i32) -> (i32, i32, i32) {
    %c0_i32 = arith.constant 0 : i32
    %c0_i32_0 = arith.constant 0 : i32
    return %arg0, %c0_i32, %arg1 : i32, i32, i32
  }
}

</mosaic_0001>

<bundles_post_ra>
// kernel: mlp_forward.1
= control target key start
LH: loop header
LB: loop body
LE: loop exit
PB: predicated region body
PF: predicated region fallthrough
CT: control target
= control target key end

     0   :  { %s1530_s18 = smov 0   ;;  %s1532_s19 = smov 0   ;;  %s2042_s0 = inlined_call_operand.vmem [shape: bf16[2,64,256], index: 0, kind: input, shape index: {}]   ;;  %s2043_s1 = inlined_call_operand.vmem [shape: bf16[256,64], index: 1, kind: input, shape index: {}]   ;;  %s2044_s2 = inlined_call_operand.vmem [shape: f32[256,1], index: 2, kind: input, shape index: {}]   ;;  %s2045_s3 = inlined_call_operand.vmem [shape: bf16[64,256], index: 3, kind: input, shape index: {}]   ;;  %s2046_s4 = inlined_call_operand.vmem [shape: f32[64,1], index: 4, kind: input, shape index: {}]   ;;  %s2047_s5 = inlined_call_operand.vmem [shape: bf16[2,64,256], index: 5, kind: output, shape index: {}]  }
   0x1   :  { %s1534_s20 = smov 0  }
   0x2 LB: > { %s27_s21 = sadd.s32 1, %s1493_s19  ;;  %p1335_p0 = scmp.ge.s32.totalorder %s1497_s20, 1  ;;  %s1497_s20 = sphi %s1534_s20, %s15_s20   ;;  %s1493_s19 = sphi %s1532_s19, %s2080_s19   ;;  %s1489_s18 = sphi %s1530_s18, %s2079_s18  }
   0x3   : > { %p29_p1 = scmp.ge.s32.totalorder %s27_s21, 2  ;;  %p208_p2 = scmp.lt.s32.totalorder %s1497_s20, 3 }
   0x5   : > { %s2082_s21 = smov (%p29_p1, %s27_s21), 0  ;;  %p209_p3 = pnand %p1335_p0, %p208_p2 }
   0x7   : > { %212 = sbr.rel (%p209_p3) target bundleno = 621 (0x26d), region = 40 }
   0xc   : > { %p245_p4 = scmp.lt.s32.totalorder %s1489_s18, 1  ;;  %v1499_v0 = vmov 0   ;;  %v319_v6 = vld [vmem:[%s2044_s2 + $0x70] sm:$0xff]  ;;  %v317_v7 = vld [vmem:[%s2044_s2 + $0x60] sm:$0xff]  ;;  %v320_v9 = vld [vmem:[%s2044_s2 + $0x78] sm:$0xff]  ;;  %vm617_vm0 = vcmask 523264  }
   0xd   : > { %698 = vmatprep.mubr.bf16.mxu0 %v1499_v0  ;;  %1433 = vset.pattern.permute.xlu0 %v1499_v0  ;;  %v318_v11 = vld [vmem:[%s2044_s2 + $0x68] sm:$0xff]  ;;  %v315_v13 = vld [vmem:[%s2044_s2 + $0x50] sm:$0xff]  ;;  %v316_v14 = vld [vmem:[%s2044_s2 + $0x58] sm:$0xff] }
   0xe   : > { %s2084_s18 = smov (!%p245_p4, %s1489_s18), 1  ;;  %1434 = vset.pattern.permute.xlu1 %v1499_v0  ;;  %409 = vperm.xlu0 %1433, %v319_v6   ;;  %v1447_v15 = vld [vmem:[%s2043_s1] sm:$0xff]   ;;  %v314_v17 = vld [vmem:[%s2044_s2 + $0x48] sm:$0xff]  ;;  %v311_v18 = vld [vmem:[%s2044_s2 + $0x30] sm:$0xff] }
   0xf   : > { %s1398_s22 = sshll.u32 %s2084_s18, 6  ;;  %399 = vperm.xlu1 %1434, %v317_v7   ;;  %v313_v16 = vld [vmem:[%s2044_s2 + $0x40] sm:$0xff]  ;;  %v312_v19 = vld [vmem:[%s2044_s2 + $0x38] sm:$0xff]  ;;  %v1448_v20 = vld [vmem:[%s2043_s1 + $0x8] sm:$0xff]  }
  0x10   : > { %s252_s25 = scalar_lea.vmem %s2042_s0, %s1398_s22  ;;  %v309_v21 = vld [vmem:[%s2044_s2 + $0x20] sm:$0xff]  ;;  %v310_v22 = vld [vmem:[%s2044_s2 + $0x28] sm:$0xff]  ;;  %v307_v23 = vld [vmem:[%s2044_s2 + $0x10] sm:$0xff]  ;;  %s2023_s11 = scalar_lea.vmem %s2047_s5, %s1398_s22 }
  0x11   : > { %v1435_v1 = vld [vmem:[%s252_s25 + $0x34] ss:$8 sps:$4 sm:$0xff]   ;;  %v1437_v2 = vld [vmem:[%s252_s25 + $0x30] ss:$8 sps:$4 sm:$0xff]   ;;  %v1438_v3 = vld [vmem:[%s252_s25 + $0x24] ss:$8 sps:$4 sm:$0xff]  }
  0x12   : > { %674 = vmatprep.subr.bf16.mxu0 %v1435_v1  ;;  %v1440_v4 = vld [vmem:[%s252_s25 + $0x20] ss:$8 sps:$4 sm:$0xff]   ;;  %v1441_v5 = vld [vmem:[%s252_s25 + $0x14] ss:$8 sps:$4 sm:$0xff]   ;;  %v1443_v8 = vld [vmem:[%s252_s25 + $0x10] ss:$8 sps:$4 sm:$0xff]   ;;  %414 = vperm.xlu0 %1433, %v320_v9  }
  0x13   : > { %675 = vmatpush1.bf16.msra.mxu0 %v1437_v2  ;;  %v1444_v10 = vld [vmem:[%s252_s25 + $0x4] ss:$8 sps:$4 sm:$0xff]   ;;  %v1446_v12 = vld [vmem:[%s252_s25] ss:$8 sps:$4 sm:$0xff]   ;;  %404 = vperm.xlu1 %1434, %v318_v11   ;;  %v1449_v24 = vld [vmem:[%s2043_s1 + $0x10] sm:$0xff]  }
  0x14   : > { %676 = vmatprep.subr.bf16.mxu0 %v1438_v3  ;;  %v308_v25 = vld [vmem:[%s2044_s2 + $0x18] sm:$0xff]  ;;  %v305_v26 = vld [vmem:[%s2044_s2] sm:$0xff]  ;;  %v306_v27 = vld [vmem:[%s2044_s2 + $0x8] sm:$0xff] }
  0x15   : > { %v335_v28 = vld [vmem:[%s2044_s2 + $0xf0] sm:$0xff]  ;;  %v336_v29 = vld [vmem:[%s2044_s2 + $0xf8] sm:$0xff]  ;;  %v333_v31 = vld [vmem:[%s2044_s2 + $0xe0] sm:$0xff] }
  0x16   : > { %389 = vperm.xlu0 %1433, %v315_v13   ;;  %v1450_v30 = vld [vmem:[%s2043_s1 + $0x18] sm:$0xff]   ;;  %v334_v32 = vld [vmem:[%s2044_s2 + $0xe8] sm:$0xff]  ;;  %v331_v33 = vld [vmem:[%s2044_s2 + $0xd0] sm:$0xff] }
  0x17   : > { %677 = vmatpush1.bf16.msra.mxu0 %v1440_v4  ;;  %394 = vperm.xlu1 %1434, %v316_v14   ;;  %v332_v34 = vld [vmem:[%s2044_s2 + $0xd8] sm:$0xff]  ;;  %v1451_v35 = vld [vmem:[%s2043_s1 + $0x20] sm:$0xff]   ;;  %v330_v37 = vld [vmem:[%s2044_s2 + $0xc8] sm:$0xff] }
  0x18   : > { %678 = vmatprep.subr.bf16.mxu0 %v1441_v5  ;;  %v329_v36 = vld [vmem:[%s2044_s2 + $0xc0] sm:$0xff]  ;;  %v327_v38 = vld [vmem:[%s2044_s2 + $0xb0] sm:$0xff]  ;;  %v328_v39 = vld [vmem:[%s2044_s2 + $0xb8] sm:$0xff] }
  0x19   : > { %v1452_v40 = vld [vmem:[%s2043_s1 + $0x28] sm:$0xff]   ;;  %v325_v41 = vld [vmem:[%s2044_s2 + $0xa0] sm:$0xff]  ;;  %v323_v43 = vld [vmem:[%s2044_s2 + $0x90] sm:$0xff] }
  0x1a   : > { %379 = vperm.xlu0 %1433, %v313_v16   ;;  %v326_v42 = vld [vmem:[%s2044_s2 + $0xa8] sm:$0xff]  ;;  %v324_v44 = vld [vmem:[%s2044_s2 + $0x98] sm:$0xff]  ;;  %v1453_v45 = vld [vmem:[%s2043_s1 + $0x30] sm:$0xff]  }
  0x1b   : > { %679 = vmatpush1.bf16.msra.mxu0 %v1443_v8  ;;  %384 = vperm.xlu1 %1434, %v314_v17   ;;  %v321_v46 = vld [vmem:[%s2044_s2 + $0x80] sm:$0xff]  ;;  %v322_v47 = vld [vmem:[%s2044_s2 + $0x88] sm:$0xff]  ;;  %v1454_v50 = vld [vmem:[%s2043_s1 + $0x38] sm:$0xff]  }
  0x1c   : > { %680 = vmatprep.subr.bf16.mxu0 %v1444_v10  ;;  %v1027_v48 = vld [vmem:[%s2046_s4] sm:$0xff]  ;;  %v1028_v49 = vld [vmem:[%s2046_s4 + $0x8] sm:$0xff]  ;;  %v1029_v51 = vld [vmem:[%s2046_s4 + $0x10] sm:$0xff] }
  0x1d   : > { %v1030_v52 = vld [vmem:[%s2046_s4 + $0x18] sm:$0xff]  ;;  %v1031_v53 = vld [vmem:[%s2046_s4 + $0x20] sm:$0xff]  ;;  %v1032_v54 = vld [vmem:[%s2046_s4 + $0x28] sm:$0xff] }
  0x1e   : > { %369 = vperm.xlu0 %1433, %v311_v18   ;;  %v1455_v55 = vld [vmem:[%s2043_s1 + $0x40] sm:$0xff]   ;;  %v1033_v56 = vld [vmem:[%s2046_s4 + $0x30] sm:$0xff]  ;;  %v1034_v57 = vld [vmem:[%s2046_s4 + $0x38] sm:$0xff] }
  0x1f   : > { %681 = vmatpush1.bf16.msra.mxu0 %v1446_v12  ;;  %374 = vperm.xlu1 %1434, %v312_v19   ;;  %v1456_v58 = vld [vmem:[%s2043_s1 + $0x48] sm:$0xff]   ;;  %v1457_v59 = vld [vmem:[%s2043_s1 + $0x50] sm:$0xff]   ;;  %v1458_v60 = vld [vmem:[%s2043_s1 + $0x58] sm:$0xff]  }
  0x20   : > { %v1459_v61 = vld [vmem:[%s2043_s1 + $0x60] sm:$0xff]   ;;  %v1460_v62 = vld [vmem:[%s2043_s1 + $0x68] sm:$0xff]   ;;  %v1461_v63 = vld [vmem:[%s2043_s1 + $0x70] sm:$0xff]  }
  0x21   : > { %v1462_v1 = vld [vmem:[%s2043_s1 + $0x78] sm:$0xff]  }
  0x22   : > { %1364 = vmatmul.mubr.msk.bf16.vlgmr.msra.gmra.mxu0 %vm617_vm0, %v1447_v15  ;;  %359 = vperm.xlu0 %1433, %v309_v21  }
  0x23   : > { %708 = vmatprep.mubr.bf16.mxu0 %v1499_v0  ;;  %364 = vperm.xlu1 %1434, %v310_v22  }
  0x26   : > { %349 = vperm.xlu0 %1433, %v307_v23  }
  0x27   : > { %354 = vperm.xlu1 %1434, %v308_v25  }
  0x2a   : > { %1365 = vmatmul.mubr.msk.bf16.gmra.mxu0 %vm617_vm0, %v1448_v20  ;;  %339 = vperm.xlu0 %1433, %v305_v26  }
  0x2b   : > { %718 = vmatprep.mubr.bf16.mxu0 %v1499_v0  ;;  %344 = vperm.xlu1 %1434, %v306_v27  }
  0x2e   : > { %489 = vperm.xlu0 %1433, %v335_v28  }
  0x2f   : > { %494 = vperm.xlu1 %1434, %v336_v29  }
  0x32   : > { %1366 = vmatmul.mubr.msk.bf16.gmra.mxu0 %vm617_vm0, %v1449_v24  ;;  %479 = vperm.xlu0 %1433, %v333_v31  }
  0x33   : > { %728 = vmatprep.mubr.bf16.mxu0 %v1499_v0  ;;  %484 = vperm.xlu1 %1434, %v334_v32  }
  0x36   : > { %469 = vperm.xlu0 %1433, %v331_v33  }
  0x37   : > { %474 = vperm.xlu1 %1434, %v332_v34  }
  0x3a   : > { %1367 = vmatmul.mubr.msk.bf16.gmra.mxu0 %vm617_vm0, %v1450_v30  ;;  %459 = vperm.xlu0 %1433, %v329_v36  }
  0x3b   : > { %738 = vmatprep.mubr.bf16.mxu0 %v1499_v0  ;;  %464 = vperm.xlu1 %1434, %v330_v37  }
  0x3e   : > { %449 = vperm.xlu0 %1433, %v327_v38  }
  0x3f   : > { %454 = vperm.xlu1 %1434, %v328_v39  }
  0x42   : > { %1368 = vmatmul.mubr.msk.bf16.gmra.mxu0 %vm617_vm0, %v1451_v35  ;;  %439 = vperm.xlu0 %1433, %v325_v41  }
  0x43   : > { %748 = vmatprep.mubr.bf16.mxu0 %v1499_v0  ;;  %444 = vperm.xlu1 %1434, %v326_v42  }
  0x46   : > { %429 = vperm.xlu0 %1433, %v323_v43  }
  0x47   : > { %434 = vperm.xlu1 %1434, %v324_v44  }
  0x4a   : > { %1369 = vmatmul.mubr.msk.bf16.gmra.mxu0 %vm617_vm0, %v1452_v40  ;;  %419 = vperm.xlu0 %1433, %v321_v46  }
  0x4b   : > { %758 = vmatprep.mubr.bf16.mxu0 %v1499_v0  ;;  %424 = vperm.xlu1 %1434, %v322_v47  }
  0x4e   : > { %1037 = vperm.xlu0 %1433, %v1027_v48  }
  0x4f   : > { %1042 = vperm.xlu1 %1434, %v1028_v49  }
  0x52   : > { %1370 = vmatmul.mubr.msk.bf16.gmra.mxu0 %vm617_vm0, %v1453_v45  ;;  %1047 = vperm.xlu0 %1433, %v1029_v51  }
  0x53   : > { %768 = vmatprep.mubr.bf16.mxu0 %v1499_v0  ;;  %1052 = vperm.xlu1 %1434, %v1030_v52  }
  0x56   : > { %1057 = vperm.xlu0 %1433, %v1031_v53  }
  0x57   : > { %1062 = vperm.xlu1 %1434, %v1032_v54  }
  0x5a   : > { %1371 = vmatmul.mubr.msk.bf16.gmra.mxu0 %vm617_vm0, %v1454_v50  ;;  %1067 = vperm.xlu0 %1433, %v1033_v56  }
  0x5b   : > { %778 = vmatprep.mubr.bf16.mxu0 %v1499_v0  ;;  %1072 = vperm.xlu1 %1434, %v1034_v57  }
  0x62   : > { %1372 = vmatmul.mubr.msk.bf16.gmra.mxu0 %vm617_vm0, %v1455_v55 }
  0x63   : > { %788 = vmatprep.mubr.bf16.mxu0 %v1499_v0 }
  0x6a   : > { %1373 = vmatmul.mubr.msk.bf16.gmra.mxu0 %vm617_vm0, %v1456_v58 }
  0x6b   : > { %798 = vmatprep.mubr.bf16.mxu0 %v1499_v0 }
  0x72   : > { %1374 = vmatmul.mubr.msk.bf16.gmra.mxu0 %vm617_vm0, %v1457_v59 }
  0x73   : > { %808 = vmatprep.mubr.bf16.mxu0 %v1499_v0 }
  0x7a   : > { %1375 = vmatmul.mubr.msk.bf16.gmra.mxu0 %vm617_vm0, %v1458_v60 }
  0x7b   : > { %818 = vmatprep.mubr.bf16.mxu0 %v1499_v0 }
  0x82   : > { %1376 = vmatmul.mubr.msk.bf16.gmra.mxu0 %vm617_vm0, %v1459_v61 }
  0x83   : > { %828 = vmatprep.mubr.bf16.mxu0 %v1499_v0 }
  0x89   : > { %v1758_v2 = vpop.permute.xlu0 %409 }
  0x8a   : > { %1377 = vmatmul.mubr.msk.bf16.gmra.mxu0 %vm617_vm0, %v1460_v62  ;;  %v1760_v3 = vpop.permute.xlu1 %399 }
  0x8b   : > { %838 = vmatprep.mubr.bf16.mxu0 %v1499_v0 }
  0x8d   : > { %v1762_v4 = vpop.permute.xlu0 %414 }
  0x8e   : > { %v1764_v5 = vpop.permute.xlu1 %404 }
  0x91   : > { %v1766_v6 = vpop.permute.xlu0 %389 }
  0x92   : > { %1378 = vmatmul.mubr.msk.bf16.gmra.mxu0 %vm617_vm0, %v1461_v63  ;;  %v1768_v7 = vpop.permute.xlu1 %394 }
  0x93   : > { %848 = vmatprep.mubr.bf16.mxu0 %v1499_v0 }
  0x95   : > { %v1770_v8 = vpop.permute.xlu0 %379 }
  0x96   : > { %v1772_v0 = vpop.permute.xlu1 %384 }
  0x99   : > { %v1774_v9 = vpop.permute.xlu0 %369 }
  0x9a   : > { %1379 = vmatmul.mubr.msk.bf16.gmra.mxu0 %vm617_vm0, %v1462_v1  ;;  %v1776_v10 = vpop.permute.xlu1 %374 }
  0x9d   : > { %v1778_v11 = vpop.permute.xlu0 %359 }
  0x9e   : > { %v1780_v12 = vpop.permute.xlu1 %364 }
  0xa1   : > { %v350_v13 = vpop.permute.xlu0 %349 }
  0xa2   : > { %v355_v14 = vpop.permute.xlu1 %354 }
  0xa5   : > { %v340_v15 = vpop.permute.xlu0 %339 }
  0xa6   : > { %v345_v19 = vpop.permute.xlu1 %344 }
  0xa9   : > { %v1806_v55 = vpop.permute.xlu0 %489 }
  0xaa   : > { %v1812_v59 = vpop.permute.xlu1 %494 }
  0xad   : > { %v1814_v61 = vpop.permute.xlu0 %479 }
  0xae   : > { %v1816_v1 = vpop.permute.xlu1 %484 }
  0xe2   : > { %v700_v16 = vpop.f32.mrf.mxu0 }
  0xe3   : > { %v701_v17 = vadd.f32 %v700_v16, %v340_v15 }
  0xe4   : > { %v702_v18 = vpop.f32.mrf.mxu0 }
  0xe5   : > { %v703_v20 = vadd.f32 %v702_v18, %v340_v15  ;;  %v859_v22 = vmax.f32 %v701_v17, 0.0  ;;  %v1820_v17 = vpop.permute.xlu1 %474  ;;  %v1465_v18 = vld [vmem:[%s2045_s3 + $0x4] ss:$8 sps:$4 sm:$0xff]  }
  0xe6   : > { %v704_v21 = vpop.f32.mrf.mxu0  ;;  %2057 = vst [vmem:[#allocation3_spill] sm:$0xff] %v1820_v17  ;;  %1147 = vmatprep.mubr.bf16.mxu1 %v1465_v18 }
  0xe7   : > { %v705_v23 = vadd.f32 %v704_v21, %v345_v19  ;;  %v860_v25 = vmax.f32 %v703_v20, 0.0  ;;  %v1782_v29 = vmin.f32 %v859_v22, 6.0 }
  0xe8   : > { %v706_v24 = vpop.f32.mrf.mxu0 }
  0xe9   : > { %v861_v26 = vmax.f32 %v705_v23, 0.0  ;;  %v707_v27 = vadd.f32 %v706_v24, %v345_v19  ;;  %v1786_v34 = vmin.f32 %v860_v25, 6.0  ;;  %v1827_v23 = vpop.permute.xlu1 %464 }
  0xea   : > { %v710_v28 = vpop.f32.mrf.mxu0  ;;  %2059 = vst [vmem:[#allocation5_spill] sm:$0xff] %v1827_v23 }
  0xeb   : > { %v1784_v30 = vmin.f32 %v861_v26, 6.0  ;;  %v862_v31 = vmax.f32 %v707_v27, 0.0  ;;  %v711_v32 = vadd.f32 %v710_v28, %v350_v13 }
  0xec   : > { %v712_v33 = vpop.f32.mrf.mxu0 }
  0xed   : > { %v1790_v36 = vmin.f32 %v862_v31, 6.0  ;;  %v713_v37 = vadd.f32 %v712_v33, %v350_v13  ;;  %v863_v40 = vmax.f32 %v711_v32, 0.0  ;;  %v1831_v28 = vpop.permute.xlu1 %454 }
  0xee   : > { %v714_v38 = vpop.f32.mrf.mxu0  ;;  %2061 = vst [vmem:[#allocation7_spill] sm:$0xff] %v1831_v28 }
  0xef   : > { %v715_v41 = vadd.f32 %v714_v38, %v355_v14  ;;  %v864_v43 = vmax.f32 %v713_v37, 0.0  ;;  %v1796_v47 = vmin.f32 %v863_v40, 6.0 }
  0xf0   : > { %v716_v42 = vpop.f32.mrf.mxu0 }
  0xf1   : > { %v865_v44 = vmax.f32 %v715_v41, 0.0  ;;  %v717_v45 = vadd.f32 %v716_v42, %v355_v14  ;;  %v1800_v51 = vmin.f32 %v864_v43, 6.0  ;;  %v1818_v14 = vpop.permute.xlu0 %469  ;;  %v1835_v38 = vpop.permute.xlu1 %444 }
  0xf2   : > { %v1794_v46 = vpop.f32.mrf.mxu0  ;;  %2056 = vst [vmem:[#allocation2_spill] sm:$0xff] %v1818_v14  ;;  %2063 = vst [vmem:[#allocation9_spill] sm:$0xff] %v1835_v38 }
  0xf3   : > { %v1798_v48 = vmin.f32 %v865_v44, 6.0  ;;  %v866_v49 = vmax.f32 %v717_v45, 0.0 }
  0xf4   : > { %v722_v50 = vpop.f32.mrf.mxu0 }
  0xf5   : > { %v1804_v53 = vmin.f32 %v866_v49, 6.0  ;;  %v1825_v20 = vpop.permute.xlu0 %459  ;;  %v1849_v49 = vadd.f32 %v722_v50, %v1778_v11  ;;  %v1864_v50 = vpop.permute.xlu1 %434 }
  0xf6   : > { %v724_v54 = vpop.f32.mrf.mxu0  ;;  %2058 = vst [vmem:[#allocation4_spill] sm:$0xff] %v1825_v20 }
  0xf7   : > { %v1852_v18 = vadd.f32 %v724_v54, %v1780_v12 }
  0xf8   : > { %v726_v57 = vpop.f32.mrf.mxu0 }
  0xf9   : > { %v1829_v25 = vpop.permute.xlu0 %449  ;;  %v1838_v40 = vadd.f32 %v726_v57, %v1780_v12 }
  0xfa   : > { %v1810_v58 = vpop.f32.mrf.mxu0  ;;  %2060 = vst [vmem:[#allocation6_spill] sm:$0xff] %v1829_v25 }
  0xfc   : > { %v732_v60 = vpop.f32.mrf.mxu0 }
  0xfd   : > { %v1833_v32 = vpop.permute.xlu0 %439  ;;  %v1858_v52 = vadd.f32 %v732_v60, %v1774_v9 }
  0xfe   : > { %v734_v62 = vpop.f32.mrf.mxu0  ;;  %2062 = vst [vmem:[#allocation8_spill] sm:$0xff] %v1833_v32 }
 0x100   : > { %v736_v63 = vpop.f32.mrf.mxu0 }
 0x101   : > { %v1840_v42 = vpop.permute.xlu0 %429  ;;  %v1843_v43 = vadd.f32 %v736_v63, %v1776_v10  ;;  %v1861_v63 = vadd.f32 %v734_v62, %v1776_v10 }
 0x102   : > { %v740_v13 = vpop.f32.mrf.mxu0 }
 0x103   : > { %v1871_v39 = vadd.f32 %v740_v13, %v1770_v8 }
 0x104   : > { %v742_v15 = vpop.f32.mrf.mxu0 }
 0x105   : > { %v1846_v44 = vadd.f32 %v742_v15, %v1770_v8 }
 0x106   : > { %v744_v16 = vpop.f32.mrf.mxu0 }
 0x108   : > { %v746_v19 = vpop.f32.mrf.mxu0 }
 0x109   : > { %v747_v54 = vadd.f32 %v746_v19, %v1772_v0 }
 0x10a   : > { %v750_v21 = vpop.f32.mrf.mxu0 }
 0x10b   : > { %v878_v25 = vmax.f32 %v747_v54, 0.0 }
 0x10c   : > { %v752_v22 = vpop.f32.mrf.mxu0 }
 0x10e   : > { %v754_v24 = vpop.f32.mrf.mxu0 }
 0x110   : > { %v756_v26 = vpop.f32.mrf.mxu0 }
 0x111   : > { %v757_v10 = vadd.f32 %v756_v26, %v1768_v7 }
 0x112   : > { %v760_v27 = vpop.f32.mrf.mxu0 }
 0x113   : > { %v761_v8 = vadd.f32 %v760_v27, %v1760_v3 }
 0x114   : > { %v762_v31 = vpop.f32.mrf.mxu0 }
 0x115   : > { %v883_v27 = vmax.f32 %v761_v8, 0.0 }
 0x116   : > { %v764_v33 = vpop.f32.mrf.mxu0 }
 0x118   : > { %v766_v37 = vpop.f32.mrf.mxu0 }
 0x119   : > { %v767_v35 = vadd.f32 %v766_v37, %v1764_v5  ;;  %v763_v37 = vadd.f32 %v762_v31, %v1760_v3  ;;  %v1878_v31 = vadd.f32 %v744_v16, %v1772_v0 }
 0x11a   : > { %v770_v41 = vpop.f32.mrf.mxu0 }
 0x11b   : > { %v771_v15 = vadd.f32 %v770_v41, %v1758_v2  ;;  %v420_v41 = vpop.permute.xlu0 %419  ;;  %v886_v32 = vmax.f32 %v767_v35, 0.0  ;;  %v884_v26 = vmax.f32 %v763_v37, 0.0  ;;  %v882_v35 = vmax.f32 %v757_v10, 0.0 }
 0x11c   : > { %v772_v45 = vpop.f32.mrf.mxu0 }
 0x11d   : > { %v773_v57 = vadd.f32 %v772_v45, %v1758_v2  ;;  %v765_v2 = vadd.f32 %v764_v33, %v1764_v5  ;;  %v887_v13 = vmax.f32 %v771_v15, 0.0  ;;  %v755_v33 = vadd.f32 %v754_v24, %v1768_v7 }
 0x11e   : > { %v774_v56 = vpop.f32.mrf.mxu0  ;;  %v948_v37 = vmin.f32 %v884_v26, 6.0  ;;  %v946_v24 = vmin.f32 %v882_v35, 6.0 }
 0x11f   : > { %v775_v45 = vadd.f32 %v774_v56, %v1762_v4  ;;  %v888_v38 = vmax.f32 %v773_v57, 0.0  ;;  %v753_v56 = vadd.f32 %v752_v22, %v1766_v6  ;;  %v885_v57 = vmax.f32 %v765_v2, 0.0 }
 0x120   : > { %v776_v62 = vpop.f32.mrf.mxu0  ;;  %v751_v22 = vadd.f32 %v750_v21, %v1766_v6  ;;  %v951_v15 = vmin.f32 %v887_v13, 6.0  ;;  %v881_v7 = vmax.f32 %v755_v33, 0.0  ;;  %v877_v6 = vmax.f32 %v1878_v31, 0.0 }
 0x121   : > { %v889_v12 = vmax.f32 %v775_v45, 0.0  ;;  %v777_v19 = vadd.f32 %v776_v62, %v1762_v4  ;;  %v425_v4 = vpop.permute.xlu1 %424  ;;  %v950_v62 = vmin.f32 %v886_v32, 6.0  ;;  %v952_v0 = vmin.f32 %v888_v38, 6.0 }
 0x122   : > { %v780_v60 = vpop.f32.mrf.mxu0  ;;  %v880_v3 = vmax.f32 %v753_v56, 0.0  ;;  %v949_v10 = vmin.f32 %v885_v57, 6.0  ;;  %v942_v33 = vmin.f32 %v878_v25, 6.0 }
 0x123   : > { %v890_v28 = vmax.f32 %v777_v19, 0.0  ;;  %v781_v5 = vadd.f32 %v780_v60, %v420_v41  ;;  %v953_v45 = vmin.f32 %v889_v12, 6.0  ;;  %v1008_v17 = vpack.c.bf16 %v950_v62, %v948_v37 }
 0x124   : > { %v782_v20 = vpop.f32.mrf.mxu0  ;;  %v944_v21 = vmin.f32 %v880_v3, 6.0  ;;  %v2064_v3 = vmax.f32 %v1846_v44, 0.0 }
 0x125   : > { %v954_v16 = vmin.f32 %v890_v28, 6.0  ;;  %v783_v23 = vadd.f32 %v782_v20, %v420_v41  ;;  %v891_v19 = vmax.f32 %v781_v5, 0.0  ;;  %v1009_v2 = vpack.c.bf16 %v953_v45, %v951_v15 }
 0x126   : > { %v784_v54 = vpop.f32.mrf.mxu0  ;;  %v879_v20 = vmax.f32 %v751_v22, 0.0  ;;  %v947_v41 = vmin.f32 %v883_v27, 6.0  ;;  %v1006_v35 = vpack.c.bf16 %v946_v24, %v944_v21  ;;  %v940_v27 = vmin.f32 %v2064_v3, 6.0 }
 0x127   : > { %v785_v60 = vadd.f32 %v784_v54, %v425_v4  ;;  %v1010_v14 = vpack.c.bf16 %v954_v16, %v952_v0  ;;  %v892_v32 = vmax.f32 %v783_v23, 0.0  ;;  %v1885_v8 = vmin.f32 %v891_v19, 6.0 }
 0x128   : > { %v786_v12 = vpop.f32.mrf.mxu0  ;;  %v945_v23 = vmin.f32 %v881_v7, 6.0  ;;  %v1007_v57 = vpack.c.bf16 %v949_v10, %v947_v41  ;;  %v731_v0 = vadd.f32 %v1810_v58, %v1774_v9  ;;  %v872_v16 = vmax.f32 %v1858_v52, 0.0 }
 0x129   : > { %v893_v38 = vmax.f32 %v785_v60, 0.0  ;;  %v787_v28 = vadd.f32 %v786_v12, %v425_v4  ;;  %1115 = vmatprep.subr.bf16.mxu1 %v1010_v14  ;;  %v1890_v45 = vmin.f32 %v892_v32, 6.0  ;;  %v943_v25 = vmin.f32 %v879_v20, 6.0 }
 0x12a   : > { %v790_v56 = vpop.f32.mrf.mxu0  ;;  %1116 = vmatpush1.bf16.msra.mxu1 %v1009_v2  ;;  %v2065_v9 = vmax.f32 %v1843_v43, 0.0  ;;  %v941_v58 = vmin.f32 %v877_v6, 6.0  ;;  %v1004_v60 = vpack.c.bf16 %v942_v33, %v940_v27  ;;  %v721_v10 = vadd.f32 %v1794_v46, %v1778_v11 }
 0x12b   : > { %v1887_v13 = vmin.f32 %v893_v38, 6.0  ;;  %v894_v26 = vmax.f32 %v787_v28, 0.0  ;;  %v791_v5 = vadd.f32 %v790_v56, %v1840_v42  ;;  %1117 = vmatprep.subr.bf16.mxu1 %v1008_v17  ;;  %v875_v17 = vmax.f32 %v1871_v39, 0.0 }
 0x12c   : > { %v792_v14 = vpop.f32.mrf.mxu0  ;;  %v938_v52 = vmin.f32 %v2065_v9, 6.0  ;;  %v1005_v39 = vpack.c.bf16 %v945_v23, %v943_v25  ;;  %v868_v12 = vmax.f32 %v1849_v49, 0.0  ;;  %v871_v2 = vmax.f32 %v731_v0, 0.0 }
 0x12d   : > { %v1011_v31 = vpack.c.bf16 %v1887_v13, %v1885_v8  ;;  %v1894_v4 = vmin.f32 %v894_v26, 6.0  ;;  %v793_v62 = vadd.f32 %v792_v14, %v1840_v42  ;;  %v895_v54 = vmax.f32 %v791_v5, 0.0  ;;  %v1471_v8 = vld [vmem:[%s2045_s3 + $0x20] ss:$8 sps:$4 sm:$0xff]   ;;  %v1472_v13 = vld [vmem:[%s2045_s3 + $0x34] ss:$8 sps:$4 sm:$0xff]  }
 0x12e   : > { %v794_v22 = vpop.f32.mrf.mxu0  ;;  %1118 = vmatpush1.bf16.msra.mxu1 %v1007_v57  ;;  %v873_v42 = vmax.f32 %v1861_v63, 0.0  ;;  %v939_v32 = vmin.f32 %v875_v17, 6.0  ;;  %v936_v43 = vmin.f32 %v872_v16, 6.0  ;;  %v869_v20 = vmax.f32 %v1852_v18, 0.0 }
 0x12f   : > { %v1012_v15 = vpack.c.bf16 %v1894_v4, %v1890_v45  ;;  %v795_v37 = vadd.f32 %v794_v22, %v1864_v50  ;;  %1119 = vmatprep.subr.bf16.mxu1 %v1006_v35  ;;  %v896_v7 = vmax.f32 %v793_v62, 0.0  ;;  %v1915_v63 = vmin.f32 %v895_v54, 6.0  ;;  %v1468_v45 = vld [vmem:[%s2045_s3 + $0x10] ss:$8 sps:$4 sm:$0xff]   ;;  %v1469_v4 = vld [vmem:[%s2045_s3 + $0x24] ss:$8 sps:$4 sm:$0xff]  }
 0x130   : > { %v796_v19 = vpop.f32.mrf.mxu0  ;;  %v937_v11 = vmin.f32 %v873_v42, 6.0  ;;  %v1003_v46 = vpack.c.bf16 %v941_v58, %v939_v32  ;;  %v1002_v41 = vpack.c.bf16 %v938_v52, %v936_v43  ;;  %v867_v33 = vmax.f32 %v721_v10, 0.0  ;;  %v2071_v43 = vld [vmem:[#allocation3_spill] sm:$0xff] }
 0x131   : > { %v897_v24 = vmax.f32 %v795_v37, 0.0  ;;  %v797_v44 = vadd.f32 %v796_v19, %v1864_v50  ;;  %v2066_v50 = vmax.f32 %v1838_v40, 0.0  ;;  %v1924_v56 = vmin.f32 %v896_v7, 6.0 }
 0x132   : > { %v1913_v38 = vpop.f32.mrf.mxu0  ;;  %1120 = vmatpush1.bf16.msra.mxu1 %v1005_v39  ;;  %v935_v23 = vmin.f32 %v871_v2, 6.0  ;;  %v932_v18 = vmin.f32 %v868_v12, 6.0  ;;  %v933_v57 = vmin.f32 %v869_v20, 6.0  ;;  %v931_v16 = vmin.f32 %v867_v33, 6.0 }
 0x133   : > { %v1917_v28 = vmin.f32 %v897_v24, 6.0  ;;  %v898_v6 = vmax.f32 %v797_v44, 0.0  ;;  %1121 = vmatprep.subr.bf16.mxu1 %v1004_v60  ;;  %v934_v21 = vmin.f32 %v2066_v50, 6.0  ;;  %v2067_v27 = vpack.c.bf16 %v1804_v53, %v1800_v51 }
 0x134   : > { %v1922_v49 = vpop.f32.mrf.mxu0  ;;  %v1001_v14 = vpack.c.bf16 %v937_v11, %v935_v23  ;;  %v999_v25 = vpack.c.bf16 %v933_v57, %v931_v16  ;;  %v2068_v42 = vpack.c.bf16 %v1798_v48, %v1796_v47  ;;  %v2069_v9 = vpack.c.bf16 %v1790_v36, %v1786_v34 }
 0x135   : > { %v1013_v26 = vpack.c.bf16 %v1917_v28, %v1915_v63  ;;  %v1928_v5 = vmin.f32 %v898_v6, 6.0  ;;  %v1000_v0 = vpack.c.bf16 %v934_v21, %v932_v18  ;;  %v2070_v39 = vpack.c.bf16 %v1784_v30, %v1782_v29  ;;  %v2072_v18 = vld [vmem:[#allocation2_spill] sm:$0xff]  ;;  %v1038_v63 = vpop.permute.xlu0 %1037 }
 0x136   : > { %v1930_v35 = vpop.f32.mrf.mxu0  ;;  %1122 = vmatpush1.bf16.msra.mxu1 %v1003_v46 }
 0x137   : > { %v1014_v40 = vpack.c.bf16 %v1928_v5, %v1924_v56  ;;  %1123 = vmatprep.subr.bf16.mxu1 %v1002_v41  ;;  %v1466_v56 = vld [vmem:[%s2045_s3 + $0x14] ss:$8 sps:$4 sm:$0xff]  }
 0x138   : > { %v1934_v62 = vpop.f32.mrf.mxu0 }
 0x13a   : > { %v1936_v17 = vpop.f32.mrf.mxu0  ;;  %1124 = vmatpush1.bf16.msra.mxu1 %v1001_v14 }
 0x13b   : > { %1125 = vmatprep.subr.bf16.mxu1 %v1000_v0  ;;  %v2073_v0 = vld [vmem:[#allocation5_spill] sm:$0xff] }
 0x13c   : > { %v1938_v22 = vpop.f32.mrf.mxu0 }
 0x13e   : > { %v1940_v3 = vpop.f32.mrf.mxu0  ;;  %1126 = vmatpush1.bf16.msra.mxu1 %v999_v25 }
 0x13f   : > { %1127 = vmatprep.subr.bf16.mxu1 %v2067_v27 }
 0x140   : > { %v816_v54 = vpop.f32.mrf.mxu0 }
 0x142   : > { %v820_v37 = vpop.f32.mrf.mxu0  ;;  %1128 = vmatpush1.bf16.msra.mxu1 %v2068_v42 }
 0x143   : > { %1129 = vmatprep.subr.bf16.mxu1 %v2069_v9 }
 0x144   : > { %v822_v52 = vpop.f32.mrf.mxu0 }
 0x146   : > { %v824_v58 = vpop.f32.mrf.mxu0  ;;  %1130 = vmatpush1.bf16.msra.mxu1 %v2070_v39 }
 0x148   : > { %v826_v19 = vpop.f32.mrf.mxu0 }
 0x149   : > { %v827_v16 = vadd.f32 %v826_v19, %v2073_v0 }
 0x14a   : > { %v830_v60 = vpop.f32.mrf.mxu0 }
 0x14c   : > { %v832_v51 = vpop.f32.mrf.mxu0 }
 0x14e   : > { %v834_v53 = vpop.f32.mrf.mxu0 }
 0x14f   : > { %v835_v25 = vadd.f32 %v834_v53, %v2071_v43 }
 0x150   : > { %v836_v7 = vpop.f32.mrf.mxu0 }
 0x151   : > { %v837_v6 = vadd.f32 %v836_v7, %v2071_v43  ;;  %v913_v19 = vmax.f32 %v835_v25, 0.0 }
 0x152   : > { %v840_v24 = vpop.f32.mrf.mxu0 }
 0x153   : > { %v841_v33 = vadd.f32 %v840_v24, %v1814_v61 }
 0x154   : > { %v842_v44 = vpop.f32.mrf.mxu0 }
 0x155   : > { %v843_v29 = vadd.f32 %v842_v44, %v1814_v61  ;;  %v831_v44 = vadd.f32 %v830_v60, %v2072_v18  ;;  %v2074_v61 = vld [vmem:[#allocation4_spill] sm:$0xff] }
 0x156   : > { %v844_v10 = vpop.f32.mrf.mxu0  ;;  %v823_v24 = vadd.f32 %v822_v52, %v2074_v61  ;;  %v821_v60 = vadd.f32 %v820_v37, %v2074_v61  ;;  %v2076_v52 = vld [vmem:[#allocation6_spill] sm:$0xff] }
 0x157   : > { %v845_v20 = vadd.f32 %v844_v10, %v1816_v1  ;;  %v916_v57 = vmax.f32 %v843_v29, 0.0  ;;  %v911_v43 = vmax.f32 %v831_v44, 0.0 }
 0x158   : > { %v846_v47 = vpop.f32.mrf.mxu0 }
 0x159   : > { %v847_v34 = vadd.f32 %v846_v47, %v1816_v1  ;;  %v917_v27 = vmax.f32 %v845_v20, 0.0  ;;  %v914_v1 = vmax.f32 %v837_v6, 0.0  ;;  %v813_v20 = vadd.f32 %v1938_v22, %v2076_v52 }
 0x15a   : > { %v850_v48 = vpop.f32.mrf.mxu0  ;;  %v975_v22 = vmin.f32 %v911_v43, 6.0 }
 0x15b   : > { %v851_v2 = vadd.f32 %v850_v48, %v1806_v55  ;;  %v918_v21 = vmax.f32 %v847_v34, 0.0  ;;  %v981_v34 = vmin.f32 %v917_v27, 6.0  ;;  %v978_v29 = vmin.f32 %v914_v1, 6.0 }
 0x15c   : > { %v852_v12 = vpop.f32.mrf.mxu0 }
 0x15d   : > { %v853_v36 = vadd.f32 %v852_v12, %v1806_v55  ;;  %v919_v23 = vmax.f32 %v851_v2, 0.0  ;;  %v833_v55 = vadd.f32 %v832_v51, %v2072_v18  ;;  %v982_v9 = vmin.f32 %v918_v21, 6.0 }
 0x15e   : > { %v854_v32 = vpop.f32.mrf.mxu0  ;;  %v980_v51 = vmin.f32 %v916_v57, 6.0  ;;  %v825_v12 = vadd.f32 %v824_v58, %v2073_v0  ;;  %v907_v57 = vmax.f32 %v821_v60, 0.0 }
 0x15f   : > { %v855_v30 = vadd.f32 %v854_v32, %v1812_v59  ;;  %v920_v11 = vmax.f32 %v853_v36, 0.0  ;;  %v983_v10 = vmin.f32 %v919_v23, 6.0  ;;  %v912_v47 = vmax.f32 %v833_v55, 0.0  ;;  %v2075_v36 = vld [vmem:[#allocation7_spill] sm:$0xff] }
 0x160   : > { %v856_v50 = vpop.f32.mrf.mxu0  ;;  %v817_v2 = vadd.f32 %v816_v54, %v2075_v36  ;;  %v910_v32 = vmax.f32 %v827_v16, 0.0  ;;  %v815_v58 = vadd.f32 %v1940_v3, %v2075_v36  ;;  %v977_v54 = vmin.f32 %v913_v19, 6.0 }
 0x161   : > { %v921_v46 = vmax.f32 %v855_v30, 0.0  ;;  %v857_v41 = vadd.f32 %v856_v50, %v1812_v59  ;;  %v984_v39 = vmin.f32 %v920_v11, 6.0  ;;  %v915_v59 = vmax.f32 %v841_v33, 0.0 }
 0x162   : > { %v1024_v30 = vpack.c.bf16 %v982_v9, %v980_v51  ;;  %v908_v50 = vmax.f32 %v823_v24, 0.0  ;;  %v976_v21 = vmin.f32 %v912_v47, 6.0  ;;  %v909_v11 = vmax.f32 %v825_v12, 0.0 }
 0x163   : > { %v922_v14 = vmax.f32 %v857_v41, 0.0  ;;  %v985_v42 = vmin.f32 %v921_v46, 6.0  ;;  %v979_v6 = vmin.f32 %v915_v59, 6.0  ;;  %v2077_v41 = vld [vmem:[#allocation9_spill] sm:$0xff]  ;;  %v906_v23 = vmax.f32 %v817_v2, 0.0 }
 0x164   : > { %v807_v33 = vadd.f32 %v1934_v62, %v2077_v41  ;;  %v974_v37 = vmin.f32 %v910_v32, 6.0  ;;  %v1022_v18 = vpack.c.bf16 %v978_v29, %v976_v21  ;;  %v811_v55 = vadd.f32 %v1936_v17, %v2076_v52  ;;  %v1463_v2 = vld [vmem:[%s2045_s3] ss:$8 sps:$4 sm:$0xff]   ;;  %v1043_v29 = vpop.permute.xlu1 %1042 }
 0x165   : > { %v986_v7 = vmin.f32 %v922_v14, 6.0  ;;  %v1025_v53 = vpack.c.bf16 %v985_v42, %v983_v10  ;;  %v1023_v46 = vpack.c.bf16 %v981_v34, %v979_v6  ;;  %v2078_v14 = vld [vmem:[#allocation8_spill] sm:$0xff]  ;;  %v904_v16 = vmax.f32 %v813_v20, 0.0  ;;  %v1048_v20 = vpop.permute.xlu0 %1047 }
 0x166   : > { %v803_v0 = vadd.f32 %v1922_v49, %v2078_v14  ;;  %v972_v3 = vmin.f32 %v908_v50, 6.0  ;;  %v805_v25 = vadd.f32 %v1930_v35, %v2077_v41  ;;  %v905_v27 = vmax.f32 %v815_v58, 0.0 }
 0x167   : > { %v1026_v48 = vpack.c.bf16 %v986_v7, %v984_v39  ;;  %v973_v62 = vmin.f32 %v909_v11, 6.0  ;;  %v1021_v42 = vpack.c.bf16 %v977_v54, %v975_v22  ;;  %v902_v1 = vmax.f32 %v807_v33, 0.0 }
 0x168   : > { %v970_v9 = vmin.f32 %v906_v23, 6.0  ;;  %v1020_v39 = vpack.c.bf16 %v974_v37, %v972_v3  ;;  %v801_v17 = vadd.f32 %v1913_v38, %v2078_v14  ;;  %v903_v7 = vmax.f32 %v811_v55, 0.0 }
 0x169   : > { %1131 = vmatprep.subr.bf16.mxu1 %v1026_v48  ;;  %v971_v44 = vmin.f32 %v907_v57, 6.0  ;;  %v900_v59 = vmax.f32 %v803_v0, 0.0  ;;  %v968_v49 = vmin.f32 %v904_v16, 6.0  ;;  %v901_v10 = vmax.f32 %v805_v25, 0.0  ;;  %v1058_v55 = vpop.permute.xlu0 %1057 }
 0x16a   : > { %1132 = vmatpush2.bf16.msra.mxu1 %v1025_v53  ;;  %v969_v61 = vmin.f32 %v905_v27, 6.0  ;;  %v966_v47 = vmin.f32 %v902_v1, 6.0  ;;  %v899_v51 = vmax.f32 %v801_v17, 0.0  ;;  %v967_v48 = vmin.f32 %v903_v7, 6.0 }
 0x16b   : > { %1133 = vmatprep.subr.bf16.mxu1 %v1024_v30  ;;  %v1019_v24 = vpack.c.bf16 %v973_v62, %v971_v44  ;;  %v1018_v35 = vpack.c.bf16 %v970_v9, %v968_v49  ;;  %v964_v12 = vmin.f32 %v900_v59, 6.0  ;;  %v965_v19 = vmin.f32 %v901_v10, 6.0 }
 0x16c   : > { %v1017_v34 = vpack.c.bf16 %v969_v61, %v967_v48  ;;  %v963_v38 = vmin.f32 %v899_v51, 6.0 }
 0x16d   : > { %v1016_v53 = vpack.c.bf16 %v966_v47, %v964_v12  ;;  %v1068_v9 = vpop.permute.xlu0 %1067 }
 0x16e   : > { %1134 = vmatpush2.bf16.msra.mxu1 %v1023_v46  ;;  %v1015_v36 = vpack.c.bf16 %v965_v19, %v963_v38  ;;  %v1053_v46 = vpop.permute.xlu1 %1052 }
 0x16f   : > { %1135 = vmatprep.subr.bf16.mxu1 %v1022_v18 }
 0x172   : > { %1136 = vmatpush2.bf16.msra.mxu1 %v1021_v42  ;;  %v1063_v3 = vpop.permute.xlu1 %1062 }
 0x173   : > { %1137 = vmatprep.subr.bf16.mxu1 %v1020_v39 }
 0x176   : > { %1138 = vmatpush2.bf16.msra.mxu1 %v1019_v24  ;;  %v1073_v49 = vpop.permute.xlu1 %1072 }
 0x177   : > { %1139 = vmatprep.subr.bf16.mxu1 %v1018_v35 }
 0x17a   : > { %1140 = vmatpush2.bf16.msra.mxu1 %v1017_v34 }
 0x17b   : > { %1141 = vmatprep.subr.bf16.mxu1 %v1016_v53 }
 0x17e   : > { %1142 = vmatpush2.bf16.msra.mxu1 %v1015_v36 }
 0x17f   : > { %1143 = vmatprep.subr.bf16.mxu1 %v1014_v40 }
 0x182   : > { %1144 = vmatpush2.bf16.msra.mxu1 %v1013_v26 }
 0x183   : > { %1145 = vmatprep.subr.bf16.mxu1 %v1012_v15 }
 0x186   : > { %1146 = vmatpush2.bf16.msra.mxu1 %v1011_v31  ;;  %v1474_v31 = vld [vmem:[%s2045_s3 + $0x30] ss:$8 sps:$4 sm:$0xff]  }
 0x189   : > { %1148 = vmatmul.mubr.bf16.vlgmr.msra.gmra.mxu1 %v1463_v2 }
 0x18a   : > { %1157 = vmatprep.mubr.bf16.mxu1 %v1466_v56 }
 0x191   : > { %1158 = vmatmul.mubr.bf16.gmra.mxu1 %v1468_v45 }
 0x192   : > { %1167 = vmatprep.mubr.bf16.mxu1 %v1469_v4 }
 0x199   : > { %1168 = vmatmul.mubr.bf16.gmra.mxu1 %v1471_v8 }
 0x19a   : > { %1177 = vmatprep.mubr.bf16.mxu1 %v1472_v13 }
 0x1a1   : > { %1178 = vmatmul.mubr.bf16.gmra.mxu1 %v1474_v31 }
 0x249   : > { %v1149_v15 = vpop.f32.mrf.mxu1 }
 0x24a   : > { %v1150_v26 = vadd.f32 %v1149_v15, %v1038_v63 }
 0x24b   : > { %v1151_v28 = vpop.f32.mrf.mxu1 }
 0x24c   : > { %v1152_v5 = vadd.f32 %v1151_v28, %v1038_v63 }
 0x24d   : > { %v1153_v40 = vpop.f32.mrf.mxu1 }
 0x24e   : > { %v1400_v32 = vpack.c.bf16 %v1152_v5, %v1150_v26  ;;  %v1154_v60 = vadd.f32 %v1153_v40, %v1043_v29 }
 0x24f   : > { %v1155_v30 = vpop.f32.mrf.mxu1 }
 0x250   : > { %1236 = vst [vmem:[%s2023_s11] sm:$0xff] %v1400_v32  ;;  %v1156_v43 = vadd.f32 %v1155_v30, %v1043_v29 }
 0x251   : > { %v1159_v6 = vpop.f32.mrf.mxu1 }
 0x252   : > { %v1401_v52 = vpack.c.bf16 %v1156_v43, %v1154_v60  ;;  %v1160_v21 = vadd.f32 %v1159_v6, %v1048_v20 }
 0x253   : > { %v1161_v50 = vpop.f32.mrf.mxu1 }
 0x254   : > { %1237 = vst [vmem:[%s2023_s11 + $0x8] sm:$0xff] %v1401_v52  ;;  %v1162_v58 = vadd.f32 %v1161_v50, %v1048_v20 }
 0x255   : > { %v1163_v11 = vpop.f32.mrf.mxu1 }
 0x256   : > { %v1402_v54 = vpack.c.bf16 %v1162_v58, %v1160_v21  ;;  %v1164_v33 = vadd.f32 %v1163_v11, %v1053_v46 }
 0x257   : > { %v1165_v41 = vpop.f32.mrf.mxu1 }
 0x258   : > { %1238 = vst [vmem:[%s2023_s11 + $0x10] sm:$0xff] %v1402_v54  ;;  %v1166_v23 = vadd.f32 %v1165_v41, %v1053_v46 }
 0x259   : > { %v1169_v37 = vpop.f32.mrf.mxu1 }
 0x25a   : > { %v1403_v18 = vpack.c.bf16 %v1166_v23, %v1164_v33  ;;  %v1170_v22 = vadd.f32 %v1169_v37, %v1058_v55 }
 0x25b   : > { %v1171_v57 = vpop.f32.mrf.mxu1 }
 0x25c   : > { %1239 = vst [vmem:[%s2023_s11 + $0x18] sm:$0xff] %v1403_v18  ;;  %v1172_v14 = vadd.f32 %v1171_v57, %v1058_v55 }
 0x25d   : > { %v1173_v0 = vpop.f32.mrf.mxu1 }
 0x25e   : > { %v1404_v16 = vpack.c.bf16 %v1172_v14, %v1170_v22  ;;  %v1174_v27 = vadd.f32 %v1173_v0, %v1063_v3 }
 0x25f   : > { %v1175_v25 = vpop.f32.mrf.mxu1 }
 0x260   : > { %1240 = vst [vmem:[%s2023_s11 + $0x20] sm:$0xff] %v1404_v16  ;;  %v1176_v62 = vadd.f32 %v1175_v25, %v1063_v3 }
 0x261   : > { %v1179_v42 = vpop.f32.mrf.mxu1 }
 0x262   : > { %v1405_v1 = vpack.c.bf16 %v1176_v62, %v1174_v27  ;;  %v1180_v17 = vadd.f32 %v1179_v42, %v1068_v9 }
 0x263   : > { %v1181_v39 = vpop.f32.mrf.mxu1 }
 0x264   : > { %1241 = vst [vmem:[%s2023_s11 + $0x28] sm:$0xff] %v1405_v1  ;;  %v1182_v7 = vadd.f32 %v1181_v39, %v1068_v9 }
 0x265   : > { %v1183_v44 = vpop.f32.mrf.mxu1 }
 0x266   : > { %v1406_v59 = vpack.c.bf16 %v1182_v7, %v1180_v17  ;;  %v1184_v61 = vadd.f32 %v1183_v44, %v1073_v49 }
 0x267   : > { %v1185_v10 = vpop.f32.mrf.mxu1 }
 0x268   : > { %1242 = vst [vmem:[%s2023_s11 + $0x30] sm:$0xff] %v1406_v59  ;;  %v1186_v24 = vadd.f32 %v1185_v10, %v1073_v49 }
 0x26a   : > { %v1407_v47 = vpack.c.bf16 %v1186_v24, %v1184_v61 }
 0x26c   : > { %1243 = vst [vmem:[%s2023_s11 + $0x38] sm:$0xff] %v1407_v47 }
 0x26d PF: > { %s15_s20 = sadd.s32 1, %s1497_s20   ;;  %s2079_s18 = smov %s1493_s19 }
 0x26e   : > { %p12_p5 = scmp.ge.s32.totalorder %s15_s20, 4   ;;  %s2080_s19 = smov %s2082_s21 }
 0x270   :  { %14 = sbr.rel (!%p12_p5) target bundleno = 2 (0x2), region = 70 }

</bundles_post_ra>
